<compile_context>
chip_gen: v7x
topology: tpu7x:2x2x1
jax: 0.10.0
libtpu: 0.0.40
codegen_flags: <defaults>
</compile_context>

<pallas_src>
import functools

import jax
import jax.numpy as jnp
from jax.experimental import pallas as pl
from jax.experimental.pallas import tpu as pltpu


def _round_up(x, m):
    return ((x + m - 1) // m) * m


# ---------------------------------------------------------------------------
# Kernel
# ---------------------------------------------------------------------------
def actor_kernel(state_ref, w2_ref, b2_ref, wh_ref, bh_ref, lo_ref, hi_ref,
                 out_ref):
    x = state_ref[...]                                   # (TB, D) f32
    # fc1 output is discarded in the reference code -> skip; ReLU on raw state.
    h = jnp.maximum(x, 0.0).astype(w2_ref.dtype)         # (TB, D)
    # fc2 + ReLU (MXU operands already in matmul dtype; f32 accumulate)
    h2 = jnp.dot(h, w2_ref[...], preferred_element_type=jnp.float32) + b2_ref[...]
    h2 = jnp.maximum(h2, 0.0).astype(wh_ref.dtype)       # (TB, H2)
    # fused mu|sigma head: one matmul into a lane-dense (TB, P) slab
    y = jnp.dot(h2, wh_ref[...], preferred_element_type=jnp.float32) + bh_ref[...]
    # per-lane clip bounds (precomputed): identity on mu lanes,
    # clamp(reparam_noise, 1.0) on sigma lanes.
    out_ref[...] = jnp.clip(y, lo_ref[...], hi_ref[...])


# ---------------------------------------------------------------------------
# Forward wrapper
# ---------------------------------------------------------------------------
@functools.partial(
    jax.jit, static_argnames=("n_actions", "tb", "single_buffer_weights"))
def _actor_forward_impl(state, arrays, *, n_actions, tb, single_buffer_weights):
    B, D = state.shape
    w2, b2 = arrays["w2"], arrays["b2"]
    wh, bh = arrays["w_head"], arrays["b_head"]
    lo, hi = arrays["clip_lo"], arrays["clip_hi"]
    H2 = w2.shape[1]
    P = wh.shape[1]
    A = n_actions

    # --- remainder-aware batch tiling; >=2 grid steps when B allows so the
    # batch axis can shard across both v7x TensorCores (neutral on v5e/v6e).
    n_tiles = max(1, pl.cdiv(B, tb))
    if B >= 16:
        n_tiles = max(n_tiles, 2)
    TB = _round_up(pl.cdiv(B, n_tiles), 8)
    B_pad = TB * n_tiles
    if B_pad != B:
        state = jnp.pad(state, ((0, B_pad - B), (0, 0)))

    def resident(shape):
        # Constant index_map -> stays VMEM-resident (no re-DMA across steps).
        kw = {"pipeline_mode": pl.Buffered(1)} if single_buffer_weights else {}
        return pl.BlockSpec(shape, lambda i: (0,) * len(shape), **kw)

    # --- VMEM budget + cost estimate -------------------------------------
    w_bytes = (w2.size * w2.dtype.itemsize + wh.size * wh.dtype.itemsize
               + (b2.size + bh.size + lo.size + hi.size) * 4)
    act_bytes = 2 * TB * D * 4 + 2 * TB * P * 4          # double-buffered io
    tmp_bytes = TB * (H2 + P) * 4                         # in-kernel f32 temps
    needed = act_bytes + (1 if single_buffer_weights else 2) * w_bytes + tmp_bytes
    vmem_limit = int(min(100 << 20, max(16 << 20, 2 * needed)))

    cost = pl.CostEstimate(
        flops=2 * B_pad * (D * H2 + H2 * P),
        transcendentals=0,
        bytes_accessed=int(B_pad * D * 4 + w_bytes + B_pad * P * 4),
    )

    out = pl.pallas_call(
        actor_kernel,
        out_shape=jax.ShapeDtypeStruct((B_pad, P), jnp.float32),
        grid_spec=pltpu.PrefetchScalarGridSpec(
            num_scalar_prefetch=0,
            grid=(n_tiles,),
            in_specs=[
                pl.BlockSpec((TB, D), lambda i: (i, 0)),   # state tile
                resident((D, H2)),                          # w2 (resident)
                resident((1, H2)),                          # b2
                resident((H2, P)),                          # fused head W
                resident((1, P)),                           # fused head b
                resident((1, P)),                           # clip lower bound
                resident((1, P)),                           # clip upper bound
            ],
            out_specs=pl.BlockSpec((TB, P), lambda i: (i, 0)),
        ),
        compiler_params=pltpu.CompilerParams(
            dimension_semantics=("parallel",),              # megacore on v7x
            vmem_limit_bytes=vmem_limit,
        ),
        cost_estimate=cost,
    )(state, w2, b2, wh, bh, lo, hi)

    mu = out[:B, :A]
    sigma = out[:B, A:2 * A]
    return mu, sigma


_SINGLE_BUFFER_WEIGHTS_OK = None  # None = not yet probed on this JAX build


def actor_forward(state, packed, *, tb=512):
    """state: (B, D) float32; packed: output of pack_inference_params.
    Returns (mu, sigma), each (B, n_actions) float32."""
    global _SINGLE_BUFFER_WEIGHTS_OK
    n_actions = packed["n_actions"]
    arrays = {k: v for k, v in packed.items() if k != "n_actions"}
    if _SINGLE_BUFFER_WEIGHTS_OK is not False:
        try:
            out = _actor_forward_impl(state, arrays, n_actions=n_actions,
                                      tb=tb, single_buffer_weights=True)
            _SINGLE_BUFFER_WEIGHTS_OK = True
            return out
        except Exception:
            # pl.Buffered(1) not accepted by this JAX/Mosaic build; fall back
            # to default double-buffered resident weights (same semantics,
            # slightly more VMEM).
            _SINGLE_BUFFER_WEIGHTS_OK = False
    return _actor_forward_impl(state, arrays, n_actions=n_actions,
                               tb=tb, single_buffer_weights=False)


# ---------------------------------------------------------------------------
# One-time parameter packing (hoisted out of the per-call path)
# ---------------------------------------------------------------------------
def pack_inference_params(params, *, matmul_dtype=jnp.bfloat16,
                          reparam_noise=1e-6):
    """Build the kernel-ready operands once per parameter update:
       * fuse mu|sigma heads into one lane-padded (H2, P>=128) slab,
       * cast matmul weights to `matmul_dtype` (bf16 default: ~3x MXU
         throughput on v5e/v6e/v7x; f32 accumulation kept in-kernel),
       * precompute per-lane clip bounds for the sigma clamp."""
    w2, b2 = params["w2"], params["b2"]
    wmu, bmu = params["w_mu"], params["b_mu"]
    wsig, bsig = params["w_sigma"], params["b_sigma"]
    H2, A = wmu.shape
    P = max(128, _round_up(2 * A, 128))          # lane-dense output slab

    w_head = jnp.zeros((H2, P), jnp.float32)
    w_head = w_head.at[:, :A].set(wmu).at[:, A:2 * A].set(wsig)
    b_head = jnp.zeros((1, P), jnp.float32)
    b_head = b_head.at[:, :A].set(bmu).at[:, A:2 * A].set(bsig)

    clip_lo = jnp.full((1, P), -jnp.inf, jnp.float32).at[:, A:2 * A].set(reparam_noise)
    clip_hi = jnp.full((1, P), jnp.inf, jnp.float32).at[:, A:2 * A].set(1.0)

    return {
        "w2": w2.astype(matmul_dtype),
        "b2": b2.astype(jnp.float32),
        "w_head": w_head.astype(matmul_dtype),
        "b_head": b_head,
        "clip_lo": clip_lo,
        "clip_hi": clip_hi,
        "n_actions": int(A),
    }


def init_params(key, input_dims, fc1_dims, fc2_dims, n_actions):
    """Deterministic synthetic parameters (PyTorch Linear shapes, pre-transposed)."""
    (d_in,) = input_dims
    ks = jax.random.split(key, 8)

    def lin(kw, kb, fan_in, fan_out):
        bound = 1.0 / jnp.sqrt(fan_in)
        w = jax.random.uniform(kw, (fan_in, fan_out), jnp.float32, -bound, bound)
        b = jax.random.uniform(kb, (1, fan_out), jnp.float32, -bound, bound)
        return w, b

    w1, b1 = lin(ks[0], ks[1], d_in, fc1_dims)   # created but unused (dead in fwd)
    w2, b2 = lin(ks[2], ks[3], fc1_dims, fc2_dims)
    wmu, bmu = lin(ks[4], ks[5], fc2_dims, n_actions)
    wsig, bsig = lin(ks[6], ks[7], fc2_dims, n_actions)
    return {
        "w1": w1, "b1": b1,
        "w2": w2, "b2": b2,
        "w_mu": wmu, "b_mu": bmu,
        "w_sigma": wsig, "b_sigma": bsig,
    }


if __name__ == "__main__":
    # Small shapes consistent with the module: input_dims must equal fc1_dims
    # for the (buggy) reference forward to be shape-valid.
    B = 2
    fc1_dims = 32
    fc2_dims = 32
    n_actions = 2
    input_dims = (fc1_dims,)

    key = jax.random.PRNGKey(0)
    kp, kx = jax.random.split(key)
    params = init_params(kp, input_dims, fc1_dims, fc2_dims, n_actions)
    state = jax.random.normal(kx, (B, input_dims[0]), jnp.float32)

    # Plain-JAX reference (same semantics as the PyTorch forward, including
    # the fc1-output-discarded / ReLU-on-raw-state behaviour).
    h_ref = jnp.maximum(state, 0.0)
    h_ref = jnp.maximum(h_ref @ params["w2"] + params["b2"], 0.0)
    mu_ref = h_ref @ params["w_mu"] + params["b_mu"]
    sig_ref = jnp.clip(h_ref @ params["w_sigma"] + params["b_sigma"], 1e-6, 1.0)

    # 1) strict f32 matmul path (matches the reference to 1e-5).
    packed_f32 = pack_inference_params(params, matmul_dtype=jnp.float32)
    mu, sigma = actor_forward(state, packed_f32)
    jax.block_until_ready((mu, sigma))
    assert mu.shape == (B, n_actions) and sigma.shape == (B, n_actions)
    assert jnp.allclose(mu, mu_ref, atol=1e-5)
    assert jnp.allclose(sigma, sig_ref, atol=1e-5)

    # 2) production path: bf16 MXU operands (f32 accumulation), looser tol.
    packed_bf16 = pack_inference_params(params)          # bf16 is the default
    mu_b, sigma_b = actor_forward(state, packed_bf16)
    jax.block_until_ready((mu_b, sigma_b))
    assert jnp.allclose(mu_b, mu_ref, atol=3e-2)
    assert jnp.allclose(sigma_b, sig_ref, atol=3e-2)

    print("KERNEL_OK")
</pallas_src>

<mosaic_0001>
module attributes {stable_mosaic.version = 11 : i64} {
  func.func @actor_kernel(%arg0: i32, %arg1: memref<8x32xf32, #tpu.memory_space<vmem>>, %arg2: memref<32x32xf32, #tpu.memory_space<vmem>>, %arg3: memref<1x32xf32, #tpu.memory_space<vmem>>, %arg4: memref<32x128xf32, #tpu.memory_space<vmem>>, %arg5: memref<1x128xf32, #tpu.memory_space<vmem>>, %arg6: memref<1x128xf32, #tpu.memory_space<vmem>>, %arg7: memref<1x128xf32, #tpu.memory_space<vmem>>, %arg8: memref<8x128xf32, #tpu.memory_space<vmem>>) attributes {dimension_semantics = [#tpu.dimension_semantics<parallel>], iteration_bounds = array<i64: 1>, scalar_prefetch = 0 : i64, scratch_operands = 0 : i64, tpu.core_type = #tpu.core_type<tc>, window_params = [{transform_indices = @transform_0, window_bounds = array<i64: 8, 32>}, {pipeline_mode = #tpu.pipeline_mode<synchronous>, transform_indices = @transform_1, window_bounds = array<i64: 32, 32>}, {pipeline_mode = #tpu.pipeline_mode<synchronous>, transform_indices = @transform_2, window_bounds = array<i64: 1, 32>}, {pipeline_mode = #tpu.pipeline_mode<synchronous>, transform_indices = @transform_3, window_bounds = array<i64: 32, 128>}, {pipeline_mode = #tpu.pipeline_mode<synchronous>, transform_indices = @transform_4, window_bounds = array<i64: 1, 128>}, {pipeline_mode = #tpu.pipeline_mode<synchronous>, transform_indices = @transform_5, window_bounds = array<i64: 1, 128>}, {pipeline_mode = #tpu.pipeline_mode<synchronous>, transform_indices = @transform_6, window_bounds = array<i64: 1, 128>}, {transform_indices = @transform_7, window_bounds = array<i64: 8, 128>}]} {
    %c0 = arith.constant 0 : index
    %c0_0 = arith.constant 0 : index
    %0 = vector.load %arg1[%c0, %c0_0] : memref<8x32xf32, #tpu.memory_space<vmem>>, vector<8x32xf32>
    %cst = arith.constant 0.000000e+00 : f32
    %1 = vector.broadcast %cst : f32 to vector<8x32xf32>
    %2 = arith.maximumf %0, %1 : vector<8x32xf32>
    %c0_1 = arith.constant 0 : index
    %c0_2 = arith.constant 0 : index
    %3 = vector.load %arg2[%c0_1, %c0_2] : memref<32x32xf32, #tpu.memory_space<vmem>>, vector<32x32xf32>
    %cst_3 = arith.constant dense<0.000000e+00> : vector<8x32xf32>
    %4 = tpu.matmul %2, %3, %cst_3 {dimension_numbers = #tpu.dot_dimension_numbers<[1], [0], [0], [1], [0, 0, 1, 1], [], []>} : vector<8x32xf32>, vector<32x32xf32>, vector<8x32xf32> -> vector<8x32xf32>
    %c0_4 = arith.constant 0 : index
    %c0_5 = arith.constant 0 : index
    %5 = vector.load %arg3[%c0_4, %c0_5] : memref<1x32xf32, #tpu.memory_space<vmem>>, vector<1x32xf32>
    %6 = vector.broadcast %5 : vector<1x32xf32> to vector<8x32xf32>
    %7 = arith.addf %4, %6 : vector<8x32xf32>
    %cst_6 = arith.constant 0.000000e+00 : f32
    %8 = vector.broadcast %cst_6 : f32 to vector<8x32xf32>
    %9 = arith.maximumf %7, %8 : vector<8x32xf32>
    %c0_7 = arith.constant 0 : index
    %c0_8 = arith.constant 0 : index
    %10 = vector.load %arg4[%c0_7, %c0_8] : memref<32x128xf32, #tpu.memory_space<vmem>>, vector<32x128xf32>
    %cst_9 = arith.constant dense<0.000000e+00> : vector<8x128xf32>
    %11 = tpu.matmul %9, %10, %cst_9 {dimension_numbers = #tpu.dot_dimension_numbers<[1], [0], [0], [1], [0, 0, 1, 1], [], []>} : vector<8x32xf32>, vector<32x128xf32>, vector<8x128xf32> -> vector<8x128xf32>
    %c0_10 = arith.constant 0 : index
    %c0_11 = arith.constant 0 : index
    %12 = vector.load %arg5[%c0_10, %c0_11] : memref<1x128xf32, #tpu.memory_space<vmem>>, vector<1x128xf32>
    %13 = vector.broadcast %12 : vector<1x128xf32> to vector<8x128xf32>
    %14 = arith.addf %11, %13 : vector<8x128xf32>
    %c0_12 = arith.constant 0 : index
    %c0_13 = arith.constant 0 : index
    %15 = vector.load %arg6[%c0_12, %c0_13] : memref<1x128xf32, #tpu.memory_space<vmem>>, vector<1x128xf32>
    %c0_14 = arith.constant 0 : index
    %c0_15 = arith.constant 0 : index
    %16 = vector.load %arg7[%c0_14, %c0_15] : memref<1x128xf32, #tpu.memory_space<vmem>>, vector<1x128xf32>
    %17 = vector.broadcast %15 : vector<1x128xf32> to vector<8x128xf32>
    %18 = arith.maximumf %17, %14 : vector<8x128xf32>
    %19 = vector.broadcast %16 : vector<1x128xf32> to vector<8x128xf32>
    %20 = arith.minimumf %19, %18 : vector<8x128xf32>
    %c0_16 = arith.constant 0 : index
    %c0_17 = arith.constant 0 : index
    %21 = vector.load %arg8[%c0_16, %c0_17] : memref<8x128xf32, #tpu.memory_space<vmem>>, vector<8x128xf32>
    tpu.vector_store %arg8[%c0_16, %c0_17], %20 {strides = array<i32>} : memref<8x128xf32, #tpu.memory_space<vmem>>, vector<8x128xf32>,
    return
  }
  func.func @transform_0(%arg0: i32) -> (i32, i32) {
    %c0_i32 = arith.constant 0 : i32
    %c0_i32_0 = arith.constant 0 : i32
    return %arg0, %c0_i32 : i32, i32
  }
  func.func @transform_1(%arg0: i32) -> (i32, i32) {
    %c0_i32 = arith.constant 0 : i32
    %c0_i32_0 = arith.constant 0 : i32
    %c0_i32_1 = arith.constant 0 : i32
    return %c0_i32, %c0_i32_0 : i32, i32
  }
  func.func @transform_2(%arg0: i32) -> (i32, i32) {
    %c0_i32 = arith.constant 0 : i32
    %c0_i32_0 = arith.constant 0 : i32
    %c0_i32_1 = arith.constant 0 : i32
    return %c0_i32, %c0_i32_0 : i32, i32
  }
  func.func @transform_3(%arg0: i32) -> (i32, i32) {
    %c0_i32 = arith.constant 0 : i32
    %c0_i32_0 = arith.constant 0 : i32
    %c0_i32_1 = arith.constant 0 : i32
    return %c0_i32, %c0_i32_0 : i32, i32
  }
  func.func @transform_4(%arg0: i32) -> (i32, i32) {
    %c0_i32 = arith.constant 0 : i32
    %c0_i32_0 = arith.constant 0 : i32
    %c0_i32_1 = arith.constant 0 : i32
    return %c0_i32, %c0_i32_0 : i32, i32
  }
  func.func @transform_5(%arg0: i32) -> (i32, i32) {
    %c0_i32 = arith.constant 0 : i32
    %c0_i32_0 = arith.constant 0 : i32
    %c0_i32_1 = arith.constant 0 : i32
    return %c0_i32, %c0_i32_0 : i32, i32
  }
  func.func @transform_6(%arg0: i32) -> (i32, i32) {
    %c0_i32 = arith.constant 0 : i32
    %c0_i32_0 = arith.constant 0 : i32
    %c0_i32_1 = arith.constant 0 : i32
    return %c0_i32, %c0_i32_0 : i32, i32
  }
  func.func @transform_7(%arg0: i32) -> (i32, i32) {
    %c0_i32 = arith.constant 0 : i32
    %c0_i32_0 = arith.constant 0 : i32
    return %arg0, %c0_i32 : i32, i32
  }
}

module attributes {stable_mosaic.version = 11 : i64} {
  func.func @actor_kernel(%arg0: i32, %arg1: memref<8x32xf32, #tpu.memory_space<vmem>>, %arg2: memref<32x32xf32, #tpu.memory_space<vmem>>, %arg3: memref<1x32xf32, #tpu.memory_space<vmem>>, %arg4: memref<32x128xf32, #tpu.memory_space<vmem>>, %arg5: memref<1x128xf32, #tpu.memory_space<vmem>>, %arg6: memref<1x128xf32, #tpu.memory_space<vmem>>, %arg7: memref<1x128xf32, #tpu.memory_space<vmem>>, %arg8: memref<8x128xf32, #tpu.memory_space<vmem>>) attributes {dimension_semantics = [#tpu.dimension_semantics<parallel>], iteration_bounds = array<i64: 1>, scalar_prefetch = 0 : i64, scratch_operands = 0 : i64, tpu.core_type = #tpu.core_type<tc>, window_params = [{transform_indices = @transform_0, window_bounds = array<i64: 8, 32>}, {pipeline_mode = #tpu.pipeline_mode<synchronous>, transform_indices = @transform_1, window_bounds = array<i64: 32, 32>}, {pipeline_mode = #tpu.pipeline_mode<synchronous>, transform_indices = @transform_2, window_bounds = array<i64: 1, 32>}, {pipeline_mode = #tpu.pipeline_mode<synchronous>, transform_indices = @transform_3, window_bounds = array<i64: 32, 128>}, {pipeline_mode = #tpu.pipeline_mode<synchronous>, transform_indices = @transform_4, window_bounds = array<i64: 1, 128>}, {pipeline_mode = #tpu.pipeline_mode<synchronous>, transform_indices = @transform_5, window_bounds = array<i64: 1, 128>}, {pipeline_mode = #tpu.pipeline_mode<synchronous>, transform_indices = @transform_6, window_bounds = array<i64: 1, 128>}, {transform_indices = @transform_7, window_bounds = array<i64: 8, 128>}]} {
    %c0 = arith.constant 0 : index
    %c0_0 = arith.constant 0 : index
    %0 = vector.load %arg1[%c0, %c0_0] : memref<8x32xf32, #tpu.memory_space<vmem>>, vector<8x32xf32>
    %cst = arith.constant 0.000000e+00 : f32
    %1 = vector.broadcast %cst : f32 to vector<8x32xf32>
    %2 = arith.maximumf %0, %1 : vector<8x32xf32>
    %c0_1 = arith.constant 0 : index
    %c0_2 = arith.constant 0 : index
    %3 = vector.load %arg2[%c0_1, %c0_2] : memref<32x32xf32, #tpu.memory_space<vmem>>, vector<32x32xf32>
    %cst_3 = arith.constant dense<0.000000e+00> : vector<8x32xf32>
    %4 = tpu.matmul %2, %3, %cst_3 {dimension_numbers = #tpu.dot_dimension_numbers<[1], [0], [0], [1], [0, 0, 1, 1], [], []>} : vector<8x32xf32>, vector<32x32xf32>, vector<8x32xf32> -> vector<8x32xf32>
    %c0_4 = arith.constant 0 : index
    %c0_5 = arith.constant 0 : index
    %5 = vector.load %arg3[%c0_4, %c0_5] : memref<1x32xf32, #tpu.memory_space<vmem>>, vector<1x32xf32>
    %6 = vector.broadcast %5 : vector<1x32xf32> to vector<8x32xf32>
    %7 = arith.addf %4, %6 : vector<8x32xf32>
    %cst_6 = arith.constant 0.000000e+00 : f32
    %8 = vector.broadcast %cst_6 : f32 to vector<8x32xf32>
    %9 = arith.maximumf %7, %8 : vector<8x32xf32>
    %c0_7 = arith.constant 0 : index
    %c0_8 = arith.constant 0 : index
    %10 = vector.load %arg4[%c0_7, %c0_8] : memref<32x128xf32, #tpu.memory_space<vmem>>, vector<32x128xf32>
    %cst_9 = arith.constant dense<0.000000e+00> : vector<8x128xf32>
    %11 = tpu.matmul %9, %10, %cst_9 {dimension_numbers = #tpu.dot_dimension_numbers<[1], [0], [0], [1], [0, 0, 1, 1], [], []>} : vector<8x32xf32>, vector<32x128xf32>, vector<8x128xf32> -> vector<8x128xf32>
    %c0_10 = arith.constant 0 : index
    %c0_11 = arith.constant 0 : index
    %12 = vector.load %arg5[%c0_10, %c0_11] : memref<1x128xf32, #tpu.memory_space<vmem>>, vector<1x128xf32>
    %13 = vector.broadcast %12 : vector<1x128xf32> to vector<8x128xf32>
    %14 = arith.addf %11, %13 : vector<8x128xf32>
    %c0_12 = arith.constant 0 : index
    %c0_13 = arith.constant 0 : index
    %15 = vector.load %arg6[%c0_12, %c0_13] : memref<1x128xf32, #tpu.memory_space<vmem>>, vector<1x128xf32>
    %c0_14 = arith.constant 0 : index
    %c0_15 = arith.constant 0 : index
    %16 = vector.load %arg7[%c0_14, %c0_15] : memref<1x128xf32, #tpu.memory_space<vmem>>, vector<1x128xf32>
    %17 = vector.broadcast %15 : vector<1x128xf32> to vector<8x128xf32>
    %18 = arith.maximumf %17, %14 : vector<8x128xf32>
    %19 = vector.broadcast %16 : vector<1x128xf32> to vector<8x128xf32>
    %20 = arith.minimumf %19, %18 : vector<8x128xf32>
    %c0_16 = arith.constant 0 : index
    %c0_17 = arith.constant 0 : index
    %21 = vector.load %arg8[%c0_16, %c0_17] : memref<8x128xf32, #tpu.memory_space<vmem>>, vector<8x128xf32>
    tpu.vector_store %arg8[%c0_16, %c0_17], %20 {strides = array<i32>} : memref<8x128xf32, #tpu.memory_space<vmem>>, vector<8x128xf32>,
    return
  }
  func.func @transform_0(%arg0: i32) -> (i32, i32) {
    %c0_i32 = arith.constant 0 : i32
    %c0_i32_0 = arith.constant 0 : i32
    return %arg0, %c0_i32 : i32, i32
  }
  func.func @transform_1(%arg0: i32) -> (i32, i32) {
    %c0_i32 = arith.constant 0 : i32
    %c0_i32_0 = arith.constant 0 : i32
    %c0_i32_1 = arith.constant 0 : i32
    return %c0_i32, %c0_i32_0 : i32, i32
  }
  func.func @transform_2(%arg0: i32) -> (i32, i32) {
    %c0_i32 = arith.constant 0 : i32
    %c0_i32_0 = arith.constant 0 : i32
    %c0_i32_1 = arith.constant 0 : i32
    return %c0_i32, %c0_i32_0 : i32, i32
  }
  func.func @transform_3(%arg0: i32) -> (i32, i32) {
    %c0_i32 = arith.constant 0 : i32
    %c0_i32_0 = arith.constant 0 : i32
    %c0_i32_1 = arith.constant 0 : i32
    return %c0_i32, %c0_i32_0 : i32, i32
  }
  func.func @transform_4(%arg0: i32) -> (i32, i32) {
    %c0_i32 = arith.constant 0 : i32
    %c0_i32_0 = arith.constant 0 : i32
    %c0_i32_1 = arith.constant 0 : i32
    return %c0_i32, %c0_i32_0 : i32, i32
  }
  func.func @transform_5(%arg0: i32) -> (i32, i32) {
    %c0_i32 = arith.constant 0 : i32
    %c0_i32_0 = arith.constant 0 : i32
    %c0_i32_1 = arith.constant 0 : i32
    return %c0_i32, %c0_i32_0 : i32, i32
  }
  func.func @transform_6(%arg0: i32) -> (i32, i32) {
    %c0_i32 = arith.constant 0 : i32
    %c0_i32_0 = arith.constant 0 : i32
    %c0_i32_1 = arith.constant 0 : i32
    return %c0_i32, %c0_i32_0 : i32, i32
  }
  func.func @transform_7(%arg0: i32) -> (i32, i32) {
    %c0_i32 = arith.constant 0 : i32
    %c0_i32_0 = arith.constant 0 : i32
    return %arg0, %c0_i32 : i32, i32
  }
}

</mosaic_0001>

<bundles_post_ra>
// kernel: _actor_forward_impl.1
= control target key start
LH: loop header
LB: loop body
LE: loop exit
PB: predicated region body
PF: predicated region fallthrough
CT: control target
= control target key end

     0   :  { %12 = vsyncpa [#allocation3], 0  ;;  %s549_s0 = inlined_call_operand.vmem [shape: f32[8,32], index: 0, kind: input, shape index: {}]   ;;  %s550_s1 = inlined_call_operand.hbm [shape: f32[32,32], index: 1, kind: input, shape index: {}]   ;;  %s551_s2 = inlined_call_operand.vmem [shape: f32[1,32], index: 2, kind: input, shape index: {}]   ;;  %s552_s3 = inlined_call_operand.vmem [shape: f32[32,128], index: 3, kind: input, shape index: {}]   ;;  %s553_s4 = inlined_call_operand.hbm [shape: f32[1,128], index: 4, kind: input, shape index: {}]   ;;  %s554_s5 = inlined_call_operand.hbm [shape: f32[1,128], index: 5, kind: input, shape index: {}]   ;;  %s555_s6 = inlined_call_operand.hbm [shape: f32[1,128], index: 6, kind: input, shape index: {}]   ;;  %s556_s7 = inlined_call_operand.vmem [shape: f32[8,128], index: 7, kind: output, shape index: {}]  }
   0x1   :  { %13 = vsyncpa [#allocation5], 0 }
   0x2   :  { %14 = vsyncpa [#allocation8], 0  ;;  %s424_s24 = smov [#allocation4]   ;;  %s425_s26 = smov [#allocation2]  }
   0x3   :  { %s39_s25 = sshll.u32 %s424_s24, 4  ;;  %s22_s27 = sshll.u32 %s425_s26, 4  ;;  %s40_s25 = int_to_ptr.vmem [resolvable:$true] %s39_s25  ;;  %s473_s27 = int_to_ptr.vmem [resolvable:$true] %s22_s27 }
   0x4   :  { %s330_s30 = scalar_lea.hbm %s553_s4, 16 }
   0x5   :  { %p331_p0 = scmp.ne.s32.totalorder %s553_s4, %s330_s30  ;;  %p334_p1 = scmp.lt.u32.totalorder %s330_s30, %s553_s4 }
   0x7   :  { %p336_p2 = pnand %p334_p1, %p331_p0 }
   0x9   :  { %339 = shalt.err (!%p336_p2)
}
   0xa   :  { %s340_s12 = scalar_lea.vmem %s40_s25, 16  ;;  %s344_s13 = scalar_lea.vmem %s40_s25, 32 }
   0xb   :  { %p341_p3 = scmp.ne.s32.totalorder %s40_s25, %s340_s12  ;;  %p345_p4 = scmp.lt.s32.totalorder %s40_s25, %s40_s25 }
   0xc   :  { %p346_p5 = scmp.lt.s32.totalorder %s344_s13, %s340_s12 }
   0xe   :  { %p347_p6 = por %p346_p5, %p345_p4 }
  0x10   :  { %p348_p7 = pnand %p347_p6, %p341_p3 }
  0x12   :  { %351 = shalt.err (!%p348_p7)
}
  0x13   :  { %42 = dma.hbm_to_vmem [thread:$0]  %s553_s4, 16, %s40_s25, [#allocation5]  }
  0x14   :  { %s352_s18 = scalar_lea.hbm %s550_s1, 512 }
  0x15   :  { %p353_p8 = scmp.ne.s32.totalorder %s550_s1, %s352_s18  ;;  %p356_p9 = scmp.lt.u32.totalorder %s352_s18, %s550_s1 }
  0x17   :  { %p358_p10 = pnand %p356_p9, %p353_p8 }
  0x19   :  { %361 = shalt.err (!%p358_p10)
}
  0x1a   :  { %s362_s23 = scalar_lea.vmem %s473_s27, 512  ;;  %p367_p12 = scmp.lt.s32.totalorder %s473_s27, %s473_s27 }
  0x1b   :  { %p363_p11 = scmp.ne.s32.totalorder %s473_s27, %s362_s23  ;;  %p368_p13 = scmp.lt.s32.totalorder %s362_s23, %s362_s23 }
  0x1d   :  { %p369_p0 = por %p368_p13, %p367_p12 }
  0x1f   :  { %p370_p1 = pnand %p369_p0, %p363_p11 }
  0x21   :  { %373 = shalt.err (!%p370_p1)
}
  0x22   :  { %s426_s4 = smov 128   ;;  %s427_s24 = smov 8  }
  0x23   :  { %28 = dma.hbm_to_vmem [thread:$0]  %s550_s1, 512, %s473_s27, [#allocation3], %s426_s4, %s426_s4, %s427_s24  }
  0x24   :  { %s428_s28 = smov [#allocation6]   ;;  %s429_s30 = smov [#allocation7]  }
  0x25   :  { %s49_s29 = sshll.u32 %s428_s28, 4  ;;  %s59_s8 = sshll.u32 %s429_s30, 4  ;;  %s50_s29 = int_to_ptr.vmem [resolvable:$true] %s49_s29  ;;  %s60_s8 = int_to_ptr.vmem [resolvable:$true] %s59_s8 }
  0x26   :  { %s374_s11 = scalar_lea.hbm %s554_s5, 16 }
  0x27   :  { %p375_p2 = scmp.ne.s32.totalorder %s554_s5, %s374_s11  ;;  %p378_p3 = scmp.lt.u32.totalorder %s374_s11, %s554_s5 }
  0x29   :  { %p380_p4 = pnand %p378_p3, %p375_p2 }
  0x2b   :  { %383 = shalt.err (!%p380_p4)
}
  0x2c   :  { %s384_s1 = scalar_lea.vmem %s50_s29, 16  ;;  %s388_s27 = scalar_lea.vmem %s50_s29, 32 }
  0x2d   :  { %p385_p5 = scmp.ne.s32.totalorder %s50_s29, %s384_s1  ;;  %p389_p6 = scmp.lt.s32.totalorder %s50_s29, %s50_s29 }
  0x2e   :  { %p390_p7 = scmp.lt.s32.totalorder %s388_s27, %s384_s1 }
  0x30   :  { %p391_p8 = por %p390_p7, %p389_p6 }
  0x32   :  { %p392_p9 = pnand %p391_p8, %p385_p5 }
  0x34   :  { %395 = shalt.err (!%p392_p9)
}
  0x35   :  { %52 = dma.hbm_to_vmem [thread:$0]  %s554_s5, 16, %s50_s29, [#allocation5]  }
  0x36   :  { %s396_s20 = scalar_lea.hbm %s555_s6, 16 }
  0x37   :  { %p397_p10 = scmp.ne.s32.totalorder %s555_s6, %s396_s20  ;;  %p400_p11 = scmp.lt.u32.totalorder %s396_s20, %s555_s6 }
  0x39   :  { %p402_p12 = pnand %p400_p11, %p397_p10 }
  0x3b   :  { %405 = shalt.err (!%p402_p12)
}
  0x3c   :  { %s406_s24 = scalar_lea.vmem %s60_s8, 16  ;;  %s410_s25 = scalar_lea.vmem %s60_s8, 32 }
  0x3d   :  { %p407_p13 = scmp.ne.s32.totalorder %s60_s8, %s406_s24  ;;  %p411_p0 = scmp.lt.s32.totalorder %s60_s8, %s60_s8 }
  0x3e   :  { %p412_p1 = scmp.lt.s32.totalorder %s410_s25, %s406_s24 }
  0x40   :  { %p413_p2 = por %p412_p1, %p411_p0 }
  0x42   :  { %p414_p3 = pnand %p413_p2, %p407_p13 }
  0x44   :  { %417 = shalt.err (!%p414_p3)
}
  0x45   :  { %62 = dma.hbm_to_vmem [thread:$0]  %s555_s6, 16, %s60_s8, [#allocation8]  }
  0x46   :  { %418 = dma.done.wait [#allocation3], 512  }
  0x47   :  { %419 = vsyncadd [#allocation3], 4294966784 }
  0x48   :  { %420 = dma.done.wait [#allocation5], 32  }
  0x49   :  { %421 = vsyncadd [#allocation5], 4294967264 }
  0x4a   :  { %422 = dma.done.wait [#allocation8], 16  }
  0x4b   :  { %423 = vsyncadd [#allocation8], 4294967280  ;;  %v430_v0 = vmov 0.0|0.0   ;;  %vm431_vm0 = vmmov 0   ;;  %v432_v1 = vmov 0.0   ;;  %v77_v2 = vld [vmem:[#allocation2] sm:$0xff] }
  0x4c   :  { %309 = vmatprep.subr.bf16.mxu0 %v430_v0  ;;  %295 = vmatprep.mubr.msk.f32.mxu0 %vm431_vm0, %v432_v1  ;;  %v78_v3 = vld [vmem:[#allocation2 + $0x8] sm:$0xff]  ;;  %v79_v4 = vld [vmem:[#allocation2 + $0x10] sm:$0xff]  ;;  %v80_v6 = vld [vmem:[#allocation2 + $0x18] sm:$0xff]  ;;  %vm88_vm1 = vcmask 261120  }
  0x4d   :  { %315 = vmatprep.subr.bf16.mxu1 %v430_v0  ;;  %306 = vmatprep.mubr.msk.f32.mxu1 %vm431_vm0, %v432_v1  ;;  %v310_v5 = vpack.c.bf16 %v78_v3, %v77_v2  ;;  %v163_v7 = vld [vmem:[%s552_s3] sm:$0xff]  ;;  %v164_v8 = vld [vmem:[%s552_s3 + $0x8] sm:$0xff]  ;;  %v313_v9 = vpack.c.bf16 %v80_v6, %v79_v4  ;;  %v165_v13 = vld [vmem:[%s552_s3 + $0x10] sm:$0xff] }
  0x4e   :  { %v75_v10 = vld [vmem:[%s549_s0] sm:$0xff]  ;;  %v316_v11 = vpack.c.bf16 %v164_v8, %v163_v7  ;;  %v166_v14 = vld [vmem:[%s552_s3 + $0x18] sm:$0xff] }
  0x4f   :  { %311 = vmatpush3.bf16.msra.mxu0 %v310_v5  ;;  %v76_v12 = vmax.f32 %v75_v10, 0.0  ;;  %v319_v15 = vpack.c.bf16 %v166_v14, %v165_v13  ;;  %v271_v16 = vld [vmem:[%s551_s2] ss:$0 sm:$0xff]  ;;  %v275_v23 = vld [vmem:[#allocation6] ss:$0 sm:$0xff] }
  0x50   :  { %312 = vmatprep.subr.bf16.mxu0 %v430_v0  ;;  %317 = vmatpush3.bf16.msra.mxu1 %v316_v11  ;;  %v273_v21 = vld [vmem:[#allocation4] ss:$0 sm:$0xff]  ;;  %v276_v26 = vld [vmem:[#allocation7] ss:$0 sm:$0xff] }
  0x51   :  { %318 = vmatprep.subr.bf16.mxu1 %v430_v0 }
  0x53   :  { %314 = vmatpush3.bf16.msra.mxu0 %v313_v9 }
  0x54   :  { %320 = vmatpush3.bf16.msra.mxu1 %v319_v15 }
  0x56   :  { %296 = vmatmul.mubr.msk.f32.vlgmr.msra.gmra.mrb[0].mxu0 %vm88_vm1, %v76_v12 }
 0x129   :  { %v158_v17 = vpop.f32.mrb[0].mxu0 }
 0x12a   :  { %v159_v18 = vadd.f32 %v271_v16, %v158_v17  ;;  %v297_v19 = vpop.f32.mrb[1].mxu0 }
 0x12c   :  { %v162_v20 = vmax.f32 %v159_v18, 0.0 }
 0x12e   :  { %307 = vmatmul.mubr.msk.f32.vlgmr.msra.gmra.mrb[0].mxu1 %vm88_vm1, %v162_v20 }
 0x201   :  { %v243_v22 = vpop.f32.mrb[0].mxu1 }
 0x202   :  { %v244_v24 = vadd.f32 %v273_v21, %v243_v22  ;;  %v308_v25 = vpop.f32.mrb[1].mxu1 }
 0x204   :  { %v255_v27 = vmax.f32 %v275_v23, %v244_v24 }
 0x206   :  { %v262_v28 = vmin.f32 %v276_v26, %v255_v27 }
 0x208   :  { %263 = vst [vmem:[%s556_s7] sm:$0xff] %v262_v28 }
 0x209   :  { %268 = vsyncpa [#allocation3], 1 }
 0x20a   :  { %269 = vsyncpa [#allocation5], 1 }
 0x20b   :  { %270 = vsyncpa [#allocation8], 1 }

// kernel: _actor_forward_impl.1
= control target key start
LH: loop header
LB: loop body
LE: loop exit
PB: predicated region body
PF: predicated region fallthrough
CT: control target
= control target key end

     0   :  { %12 = vsyncpa [#allocation3], 0  ;;  %s549_s0 = inlined_call_operand.vmem [shape: f32[8,32], index: 0, kind: input, shape index: {}]   ;;  %s550_s1 = inlined_call_operand.hbm [shape: f32[32,32], index: 1, kind: input, shape index: {}]   ;;  %s551_s2 = inlined_call_operand.vmem [shape: f32[1,32], index: 2, kind: input, shape index: {}]   ;;  %s552_s3 = inlined_call_operand.vmem [shape: f32[32,128], index: 3, kind: input, shape index: {}]   ;;  %s553_s4 = inlined_call_operand.hbm [shape: f32[1,128], index: 4, kind: input, shape index: {}]   ;;  %s554_s5 = inlined_call_operand.hbm [shape: f32[1,128], index: 5, kind: input, shape index: {}]   ;;  %s555_s6 = inlined_call_operand.hbm [shape: f32[1,128], index: 6, kind: input, shape index: {}]   ;;  %s556_s7 = inlined_call_operand.vmem [shape: f32[8,128], index: 7, kind: output, shape index: {}]  }
   0x1   :  { %13 = vsyncpa [#allocation5], 0 }
   0x2   :  { %14 = vsyncpa [#allocation8], 0  ;;  %s424_s24 = smov [#allocation4]   ;;  %s425_s26 = smov [#allocation2]  }
   0x3   :  { %s39_s25 = sshll.u32 %s424_s24, 4  ;;  %s22_s27 = sshll.u32 %s425_s26, 4  ;;  %s40_s25 = int_to_ptr.vmem [resolvable:$true] %s39_s25  ;;  %s473_s27 = int_to_ptr.vmem [resolvable:$true] %s22_s27 }
   0x4   :  { %s330_s30 = scalar_lea.hbm %s553_s4, 16 }
   0x5   :  { %p331_p0 = scmp.ne.s32.totalorder %s553_s4, %s330_s30  ;;  %p334_p1 = scmp.lt.u32.totalorder %s330_s30, %s553_s4 }
   0x7   :  { %p336_p2 = pnand %p334_p1, %p331_p0 }
   0x9   :  { %339 = shalt.err (!%p336_p2)
}
   0xa   :  { %s340_s12 = scalar_lea.vmem %s40_s25, 16  ;;  %s344_s13 = scalar_lea.vmem %s40_s25, 32 }
   0xb   :  { %p341_p3 = scmp.ne.s32.totalorder %s40_s25, %s340_s12  ;;  %p345_p4 = scmp.lt.s32.totalorder %s40_s25, %s40_s25 }
   0xc   :  { %p346_p5 = scmp.lt.s32.totalorder %s344_s13, %s340_s12 }
   0xe   :  { %p347_p6 = por %p346_p5, %p345_p4 }
  0x10   :  { %p348_p7 = pnand %p347_p6, %p341_p3 }
  0x12   :  { %351 = shalt.err (!%p348_p7)
}
  0x13   :  { %42 = dma.hbm_to_vmem [thread:$0]  %s553_s4, 16, %s40_s25, [#allocation5]  }
  0x14   :  { %s352_s18 = scalar_lea.hbm %s550_s1, 512 }
  0x15   :  { %p353_p8 = scmp.ne.s32.totalorder %s550_s1, %s352_s18  ;;  %p356_p9 = scmp.lt.u32.totalorder %s352_s18, %s550_s1 }
  0x17   :  { %p358_p10 = pnand %p356_p9, %p353_p8 }
  0x19   :  { %361 = shalt.err (!%p358_p10)
}
  0x1a   :  { %s362_s23 = scalar_lea.vmem %s473_s27, 512  ;;  %p367_p12 = scmp.lt.s32.totalorder %s473_s27, %s473_s27 }
  0x1b   :  { %p363_p11 = scmp.ne.s32.totalorder %s473_s27, %s362_s23  ;;  %p368_p13 = scmp.lt.s32.totalorder %s362_s23, %s362_s23 }
  0x1d   :  { %p369_p0 = por %p368_p13, %p367_p12 }
  0x1f   :  { %p370_p1 = pnand %p369_p0, %p363_p11 }
  0x21   :  { %373 = shalt.err (!%p370_p1)
}
  0x22   :  { %s426_s4 = smov 128   ;;  %s427_s24 = smov 8  }
  0x23   :  { %28 = dma.hbm_to_vmem [thread:$0]  %s550_s1, 512, %s473_s27, [#allocation3], %s426_s4, %s426_s4, %s427_s24  }
  0x24   :  { %s428_s28 = smov [#allocation6]   ;;  %s429_s30 = smov [#allocation7]  }
  0x25   :  { %s49_s29 = sshll.u32 %s428_s28, 4  ;;  %s59_s8 = sshll.u32 %s429_s30, 4  ;;  %s50_s29 = int_to_ptr.vmem [resolvable:$true] %s49_s29  ;;  %s60_s8 = int_to_ptr.vmem [resolvable:$true] %s59_s8 }
  0x26   :  { %s374_s11 = scalar_lea.hbm %s554_s5, 16 }
  0x27   :  { %p375_p2 = scmp.ne.s32.totalorder %s554_s5, %s374_s11  ;;  %p378_p3 = scmp.lt.u32.totalorder %s374_s11, %s554_s5 }
  0x29   :  { %p380_p4 = pnand %p378_p3, %p375_p2 }
  0x2b   :  { %383 = shalt.err (!%p380_p4)
}
  0x2c   :  { %s384_s1 = scalar_lea.vmem %s50_s29, 16  ;;  %s388_s27 = scalar_lea.vmem %s50_s29, 32 }
  0x2d   :  { %p385_p5 = scmp.ne.s32.totalorder %s50_s29, %s384_s1  ;;  %p389_p6 = scmp.lt.s32.totalorder %s50_s29, %s50_s29 }
  0x2e   :  { %p390_p7 = scmp.lt.s32.totalorder %s388_s27, %s384_s1 }
  0x30   :  { %p391_p8 = por %p390_p7, %p389_p6 }
  0x32   :  { %p392_p9 = pnand %p391_p8, %p385_p5 }
  0x34   :  { %395 = shalt.err (!%p392_p9)
}
  0x35   :  { %52 = dma.hbm_to_vmem [thread:$0]  %s554_s5, 16, %s50_s29, [#allocation5]  }
  0x36   :  { %s396_s20 = scalar_lea.hbm %s555_s6, 16 }
  0x37   :  { %p397_p10 = scmp.ne.s32.totalorder %s555_s6, %s396_s20  ;;  %p400_p11 = scmp.lt.u32.totalorder %s396_s20, %s555_s6 }
  0x39   :  { %p402_p12 = pnand %p400_p11, %p397_p10 }
  0x3b   :  { %405 = shalt.err (!%p402_p12)
}
  0x3c   :  { %s406_s24 = scalar_lea.vmem %s60_s8, 16  ;;  %s410_s25 = scalar_lea.vmem %s60_s8, 32 }
  0x3d   :  { %p407_p13 = scmp.ne.s32.totalorder %s60_s8, %s406_s24  ;;  %p411_p0 = scmp.lt.s32.totalorder %s60_s8, %s60_s8 }
  0x3e   :  { %p412_p1 = scmp.lt.s32.totalorder %s410_s25, %s406_s24 }
  0x40   :  { %p413_p2 = por %p412_p1, %p411_p0 }
  0x42   :  { %p414_p3 = pnand %p413_p2, %p407_p13 }
  0x44   :  { %417 = shalt.err (!%p414_p3)
}
  0x45   :  { %62 = dma.hbm_to_vmem [thread:$0]  %s555_s6, 16, %s60_s8, [#allocation8]  }
  0x46   :  { %418 = dma.done.wait [#allocation3], 512  }
  0x47   :  { %419 = vsyncadd [#allocation3], 4294966784 }
  0x48   :  { %420 = dma.done.wait [#allocation5], 32  }
  0x49   :  { %421 = vsyncadd [#allocation5], 4294967264 }
  0x4a   :  { %422 = dma.done.wait [#allocation8], 16  }
  0x4b   :  { %423 = vsyncadd [#allocation8], 4294967280  ;;  %v430_v0 = vmov 0.0|0.0   ;;  %vm431_vm0 = vmmov 0   ;;  %v432_v1 = vmov 0.0   ;;  %v77_v2 = vld [vmem:[#allocation2] sm:$0xff] }
  0x4c   :  { %309 = vmatprep.subr.bf16.mxu0 %v430_v0  ;;  %295 = vmatprep.mubr.msk.f32.mxu0 %vm431_vm0, %v432_v1  ;;  %v78_v3 = vld [vmem:[#allocation2 + $0x8] sm:$0xff]  ;;  %v79_v4 = vld [vmem:[#allocation2 + $0x10] sm:$0xff]  ;;  %v80_v6 = vld [vmem:[#allocation2 + $0x18] sm:$0xff]  ;;  %vm88_vm1 = vcmask 261120  }
  0x4d   :  { %315 = vmatprep.subr.bf16.mxu1 %v430_v0  ;;  %306 = vmatprep.mubr.msk.f32.mxu1 %vm431_vm0, %v432_v1  ;;  %v310_v5 = vpack.c.bf16 %v78_v3, %v77_v2  ;;  %v163_v7 = vld [vmem:[%s552_s3] sm:$0xff]  ;;  %v164_v8 = vld [vmem:[%s552_s3 + $0x8] sm:$0xff]  ;;  %v313_v9 = vpack.c.bf16 %v80_v6, %v79_v4  ;;  %v165_v13 = vld [vmem:[%s552_s3 + $0x10] sm:$0xff] }
  0x4e   :  { %v75_v10 = vld [vmem:[%s549_s0] sm:$0xff]  ;;  %v316_v11 = vpack.c.bf16 %v164_v8, %v163_v7  ;;  %v166_v14 = vld [vmem:[%s552_s3 + $0x18] sm:$0xff] }
  0x4f   :  { %311 = vmatpush3.bf16.msra.mxu0 %v310_v5  ;;  %v76_v12 = vmax.f32 %v75_v10, 0.0  ;;  %v319_v15 = vpack.c.bf16 %v166_v14, %v165_v13  ;;  %v271_v16 = vld [vmem:[%s551_s2] ss:$0 sm:$0xff]  ;;  %v275_v23 = vld [vmem:[#allocation6] ss:$0 sm:$0xff] }
  0x50   :  { %312 = vmatprep.subr.bf16.mxu0 %v430_v0  ;;  %317 = vmatpush3.bf16.msra.mxu1 %v316_v11  ;;  %v273_v21 = vld [vmem:[#allocation4] ss:$0 sm:$0xff]  ;;  %v276_v26 = vld [vmem:[#allocation7] ss:$0 sm:$0xff] }
  0x51   :  { %318 = vmatprep.subr.bf16.mxu1 %v430_v0 }
  0x53   :  { %314 = vmatpush3.bf16.msra.mxu0 %v313_v9 }
  0x54   :  { %320 = vmatpush3.bf16.msra.mxu1 %v319_v15 }
  0x56   :  { %296 = vmatmul.mubr.msk.f32.vlgmr.msra.gmra.mrb[0].mxu0 %vm88_vm1, %v76_v12 }
 0x129   :  { %v158_v17 = vpop.f32.mrb[0].mxu0 }
 0x12a   :  { %v159_v18 = vadd.f32 %v271_v16, %v158_v17  ;;  %v297_v19 = vpop.f32.mrb[1].mxu0 }
 0x12c   :  { %v162_v20 = vmax.f32 %v159_v18, 0.0 }
 0x12e   :  { %307 = vmatmul.mubr.msk.f32.vlgmr.msra.gmra.mrb[0].mxu1 %vm88_vm1, %v162_v20 }
 0x201   :  { %v243_v22 = vpop.f32.mrb[0].mxu1 }
 0x202   :  { %v244_v24 = vadd.f32 %v273_v21, %v243_v22  ;;  %v308_v25 = vpop.f32.mrb[1].mxu1 }
 0x204   :  { %v255_v27 = vmax.f32 %v275_v23, %v244_v24 }
 0x206   :  { %v262_v28 = vmin.f32 %v276_v26, %v255_v27 }
 0x208   :  { %263 = vst [vmem:[%s556_s7] sm:$0xff] %v262_v28 }
 0x209   :  { %268 = vsyncpa [#allocation3], 1 }
 0x20a   :  { %269 = vsyncpa [#allocation5], 1 }
 0x20b   :  { %270 = vsyncpa [#allocation8], 1 }

</bundles_post_ra>
